<compile_context>
chip_gen: v5e
topology: v5e:2x2
jax: 0.10.0
libtpu: 0.0.40
codegen_flags: <defaults>
</compile_context>

<pallas_src>
import jax
import jax.numpy as jnp
from jax.experimental import pallas as pl
from jax.experimental.pallas import tpu as pltpu


def _make_attn_fusion_kernel(num_views):
    """Kernel over one batch tile: refs = (*view_refs[TB,D], w_ref[1,D], out_ref[TB,D])."""

    def kernel(*refs):
        view_refs = refs[:num_views]
        w_ref = refs[num_views]
        out_ref = refs[num_views + 1]

        w = w_ref[...]  # [1, D], same dtype as the views (lane-dense)

        # ---- Pass 1 (streaming): per-view scores; only [TB,1] f32 temps stay live. ----
        # VPU multiply in the input dtype (bf16 VALU on v6e/v7x), lane reduce into f32.
        # (Bias omitted: a scalar bias shared across views cancels in the view softmax.)
        scores = [
            jnp.sum(r[...] * w, axis=-1, keepdims=True, dtype=jnp.float32)
            for r in view_refs
        ]

        # Numerically stable softmax over the (static, small) view axis.
        m = scores[0]
        for s in scores[1:]:
            m = jnp.maximum(m, s)
        es = [jnp.exp(s - m) for s in scores]
        denom = es[0]
        for e in es[1:]:
            denom = denom + e
        inv = pl.reciprocal(denom, approx=True)  # [TB, 1], EUP slot

        # ---- Pass 2 (streaming): re-read each view, accumulate alpha_v * x_v in f32. ----
        acc = (es[0] * inv) * view_refs[0][...].astype(jnp.float32)
        for e, r in zip(es[1:], view_refs[1:]):
            acc = acc + (e * inv) * r[...].astype(jnp.float32)
        out_ref[...] = acc.astype(out_ref.dtype)

    return kernel


def _vmem_capacity_bytes():
    try:
        return int(pltpu.get_tpu_info().vmem_capacity_bytes)
    except Exception:
        return 64 << 20  # v7x-safe fallback


def _pick_tile_b(B, D, num_views, dtype, vmem_cap, min_grid_steps=8):
    """Batch tile: fits VMEM (blocks + in-kernel f32 temps), ~2 MiB/view tile, >=8 steps."""
    itemsize = int(jnp.dtype(dtype).itemsize)
    pack = {4: 8, 2: 16, 1: 32}.get(itemsize, 8)  # sublane pack per dtype
    if B <= pack:
        return B  # block equals full array dim -> always legal

    # Spend ~half of the scoped limit (~0.75 * capacity) on block buffers + temps.
    budget = (vmem_cap * 3) // 8
    # Per batch-row VMEM cost:
    #   double-buffered block buffers: 2 * (V inputs + 1 output) * D * itemsize
    #   in-kernel f32 temps (two-pass streaming): ~2 live f32 [TB, D] tiles
    bytes_per_row = 2 * (num_views + 1) * D * itemsize + 2 * D * 4
    tb = budget // max(bytes_per_row, 1)

    # Per-tile byte target (~2 MiB per view tile): amortizes the ~0.35 us/step overhead
    # while leaving enough grid steps for pipelining.
    tb = min(tb, max(pack, (2 << 20) // max(D * itemsize, 1)))

    # Keep >= min_grid_steps grid steps whenever B permits (pipelining + megacore).
    tb = min(tb, pl.cdiv(B, min_grid_steps))

    tb = max(pack, (int(tb) // pack) * pack)
    if tb >= B:
        return B
    return int(tb)


def attention_decoder_forward(x_list, w, b=None):
    """Forward of AttentionDecoder(feature_dim, num_views, method='linear_projection').

    x_list: list of `num_views` arrays, each [B, feature_dim] (f32 or bf16, dtype preserved).
    w:      [feature_dim] scoring weight (nn.Linear(feature_dim, 1).weight).
    b:      scoring bias — accepted for API parity; it is a scalar shared across views, so it
            cancels in the view softmax and is not used.
    Returns the fused features [B, feature_dim] in the input dtype.
    """
    del b  # scalar bias shared across views cancels in the softmax over views
    x_list = [jnp.asarray(x) for x in x_list]
    num_views = len(x_list)
    B, D = x_list[0].shape
    dtype = x_list[0].dtype

    # Keep the output block lane-dense: pad feature_dim to a multiple of 128 if needed.
    Dp = ((D + 127) // 128) * 128
    if Dp != D:
        pad = [(0, 0), (0, Dp - D)]
        x_list = [jnp.pad(x, pad) for x in x_list]
        w_full = jnp.pad(jnp.asarray(w, jnp.float32).reshape(-1), (0, Dp - D))
    else:
        w_full = jnp.asarray(w, jnp.float32).reshape(-1)
    w2 = w_full.reshape(1, Dp).astype(dtype)  # lane-dense, same dtype as views

    vmem_cap = _vmem_capacity_bytes()
    tb = _pick_tile_b(B, Dp, num_views, dtype, vmem_cap)
    grid = (pl.cdiv(B, tb),)

    view_spec = pl.BlockSpec((tb, Dp), lambda i: (i, 0))
    in_specs = [view_spec] * num_views + [pl.BlockSpec((1, Dp), lambda i: (0, 0))]
    out_spec = pl.BlockSpec((tb, Dp), lambda i: (i, 0))

    out = pl.pallas_call(
        _make_attn_fusion_kernel(num_views),
        out_shape=jax.ShapeDtypeStruct((B, Dp), dtype),
        grid=grid,
        in_specs=in_specs,
        out_specs=out_spec,
        compiler_params=pltpu.CompilerParams(
            dimension_semantics=("parallel",),       # shards the B axis across TCs on v7x
            vmem_limit_bytes=(vmem_cap * 3) // 4,    # generation-aware scoped limit
        ),
    )(*x_list, w2)

    if Dp != D:
        out = out[:, :D]
    return out


def _reference(x_list, w, b=0.0):
    x = jnp.stack([jnp.asarray(v).astype(jnp.float32) for v in x_list], axis=0)  # [V, B, D]
    scores = jnp.einsum("vbd,d->vb", x, jnp.asarray(w, jnp.float32)) + b          # [V, B]
    alpha = jax.nn.softmax(scores, axis=0)[..., None]                             # [V, B, 1]
    return jnp.sum(alpha * x, axis=0)                                             # [B, D]


if __name__ == "__main__":
    key = jax.random.PRNGKey(0)
    num_views, batch, feature_dim = 3, 16, 128   # small test shapes; D multiple of 128

    keys = jax.random.split(key, num_views + 2)
    x32 = [jax.random.normal(keys[v], (batch, feature_dim), jnp.float32)
           for v in range(num_views)]
    w = jax.random.normal(keys[num_views], (feature_dim,), jnp.float32) * 0.1
    b = jax.random.normal(keys[num_views + 1], (), jnp.float32) * 0.1

    # f32 path (grid of 2 batch tiles -> exercises pipelined tiling)
    out = jax.block_until_ready(attention_decoder_forward(x32, w, b))
    ref = _reference(x32, w, b)
    assert out.shape == (batch, feature_dim)
    # tolerance accounts for the approx EUP reciprocal in the softmax denominator
    assert jnp.allclose(out, ref, atol=1e-2, rtol=1e-2), "f32 mismatch vs reference"

    # bf16 path (halves HBM bytes; f32 softmax/accumulation inside the kernel)
    xbf = [x.astype(jnp.bfloat16) for x in x32]
    out_bf = jax.block_until_ready(attention_decoder_forward(xbf, w, b))
    ref_bf = _reference(xbf, w, b)
    assert out_bf.dtype == jnp.bfloat16
    assert jnp.allclose(out_bf.astype(jnp.float32), ref_bf, atol=5e-2, rtol=5e-2), \
        "bf16 mismatch vs reference"

    print("KERNEL_OK")
</pallas_src>

<mosaic_0001>
module attributes {stable_mosaic.version = 11 : i64} {
  func.func @kernel(%arg0: i32, %arg1: memref<8x128xf32, #tpu.memory_space<vmem>>, %arg2: memref<8x128xf32, #tpu.memory_space<vmem>>, %arg3: memref<8x128xf32, #tpu.memory_space<vmem>>, %arg4: memref<1x128xf32, #tpu.memory_space<vmem>>, %arg5: memref<8x128xf32, #tpu.memory_space<vmem>>) attributes {dimension_semantics = [#tpu.dimension_semantics<parallel>], iteration_bounds = array<i64: 2>, scalar_prefetch = 0 : i64, scratch_operands = 0 : i64, tpu.core_type = #tpu.core_type<tc>, window_params = [{transform_indices = @transform_0, window_bounds = array<i64: 8, 128>}, {transform_indices = @transform_1, window_bounds = array<i64: 8, 128>}, {transform_indices = @transform_2, window_bounds = array<i64: 8, 128>}, {pipeline_mode = #tpu.pipeline_mode<synchronous>, transform_indices = @transform_3, window_bounds = array<i64: 1, 128>}, {transform_indices = @transform_4, window_bounds = array<i64: 8, 128>}]} {
    %c0 = arith.constant 0 : index
    %c0_0 = arith.constant 0 : index
    %0 = vector.load %arg4[%c0, %c0_0] : memref<1x128xf32, #tpu.memory_space<vmem>>, vector<1x128xf32>
    %c0_1 = arith.constant 0 : index
    %c0_2 = arith.constant 0 : index
    %1 = vector.load %arg1[%c0_1, %c0_2] : memref<8x128xf32, #tpu.memory_space<vmem>>, vector<8x128xf32>
    %2 = vector.broadcast %0 : vector<1x128xf32> to vector<8x128xf32>
    %3 = arith.mulf %1, %2 : vector<8x128xf32>
    %cst = arith.constant dense<0.000000e+00> : vector<8xf32>
    %4 = vector.multi_reduction <add>, %3, %cst [1] : vector<8x128xf32> to vector<8xf32>
    %5 = vector.shape_cast %4 : vector<8xf32> to vector<8x1xf32>
    %c0_3 = arith.constant 0 : index
    %c0_4 = arith.constant 0 : index
    %6 = vector.load %arg2[%c0_3, %c0_4] : memref<8x128xf32, #tpu.memory_space<vmem>>, vector<8x128xf32>
    %7 = vector.broadcast %0 : vector<1x128xf32> to vector<8x128xf32>
    %8 = arith.mulf %6, %7 : vector<8x128xf32>
    %cst_5 = arith.constant dense<0.000000e+00> : vector<8xf32>
    %9 = vector.multi_reduction <add>, %8, %cst_5 [1] : vector<8x128xf32> to vector<8xf32>
    %10 = vector.shape_cast %9 : vector<8xf32> to vector<8x1xf32>
    %c0_6 = arith.constant 0 : index
    %c0_7 = arith.constant 0 : index
    %11 = vector.load %arg3[%c0_6, %c0_7] : memref<8x128xf32, #tpu.memory_space<vmem>>, vector<8x128xf32>
    %12 = vector.broadcast %0 : vector<1x128xf32> to vector<8x128xf32>
    %13 = arith.mulf %11, %12 : vector<8x128xf32>
    %cst_8 = arith.constant dense<0.000000e+00> : vector<8xf32>
    %14 = vector.multi_reduction <add>, %13, %cst_8 [1] : vector<8x128xf32> to vector<8xf32>
    %15 = vector.shape_cast %14 : vector<8xf32> to vector<8x1xf32>
    %16 = arith.maximumf %5, %10 : vector<8x1xf32>
    %17 = arith.maximumf %16, %15 : vector<8x1xf32>
    %18 = arith.subf %5, %17 : vector<8x1xf32>
    %19 = math.exp %18 : vector<8x1xf32>
    %20 = arith.subf %10, %17 : vector<8x1xf32>
    %21 = math.exp %20 : vector<8x1xf32>
    %22 = arith.subf %15, %17 : vector<8x1xf32>
    %23 = math.exp %22 : vector<8x1xf32>
    %24 = arith.addf %19, %21 : vector<8x1xf32>
    %25 = arith.addf %24, %23 : vector<8x1xf32>
    %26 = tpu.reciprocal %25 {approx = true} : vector<8x1xf32> -> vector<8x1xf32>
    %27 = arith.mulf %19, %26 : vector<8x1xf32>
    %c0_9 = arith.constant 0 : index
    %c0_10 = arith.constant 0 : index
    %28 = vector.load %arg1[%c0_9, %c0_10] : memref<8x128xf32, #tpu.memory_space<vmem>>, vector<8x128xf32>
    %29 = vector.broadcast %27 : vector<8x1xf32> to vector<8x128xf32>
    %30 = arith.mulf %29, %28 : vector<8x128xf32>
    %31 = arith.mulf %21, %26 : vector<8x1xf32>
    %c0_11 = arith.constant 0 : index
    %c0_12 = arith.constant 0 : index
    %32 = vector.load %arg2[%c0_11, %c0_12] : memref<8x128xf32, #tpu.memory_space<vmem>>, vector<8x128xf32>
    %33 = vector.broadcast %31 : vector<8x1xf32> to vector<8x128xf32>
    %34 = arith.mulf %33, %32 : vector<8x128xf32>
    %35 = arith.addf %30, %34 : vector<8x128xf32>
    %36 = arith.mulf %23, %26 : vector<8x1xf32>
    %c0_13 = arith.constant 0 : index
    %c0_14 = arith.constant 0 : index
    %37 = vector.load %arg3[%c0_13, %c0_14] : memref<8x128xf32, #tpu.memory_space<vmem>>, vector<8x128xf32>
    %38 = vector.broadcast %36 : vector<8x1xf32> to vector<8x128xf32>
    %39 = arith.mulf %38, %37 : vector<8x128xf32>
    %40 = arith.addf %35, %39 : vector<8x128xf32>
    %c0_15 = arith.constant 0 : index
    %c0_16 = arith.constant 0 : index
    %41 = vector.load %arg5[%c0_15, %c0_16] : memref<8x128xf32, #tpu.memory_space<vmem>>, vector<8x128xf32>
    tpu.vector_store %arg5[%c0_15, %c0_16], %40 {strides = array<i32>} : memref<8x128xf32, #tpu.memory_space<vmem>>, vector<8x128xf32>,
    return
  }
  func.func @transform_0(%arg0: i32) -> (i32, i32) {
    %c0_i32 = arith.constant 0 : i32
    %c0_i32_0 = arith.constant 0 : i32
    return %arg0, %c0_i32 : i32, i32
  }
  func.func @transform_1(%arg0: i32) -> (i32, i32) {
    %c0_i32 = arith.constant 0 : i32
    %c0_i32_0 = arith.constant 0 : i32
    return %arg0, %c0_i32 : i32, i32
  }
  func.func @transform_2(%arg0: i32) -> (i32, i32) {
    %c0_i32 = arith.constant 0 : i32
    %c0_i32_0 = arith.constant 0 : i32
    return %arg0, %c0_i32 : i32, i32
  }
  func.func @transform_3(%arg0: i32) -> (i32, i32) {
    %c0_i32 = arith.constant 0 : i32
    %c0_i32_0 = arith.constant 0 : i32
    %c0_i32_1 = arith.constant 0 : i32
    return %c0_i32, %c0_i32_0 : i32, i32
  }
  func.func @transform_4(%arg0: i32) -> (i32, i32) {
    %c0_i32 = arith.constant 0 : i32
    %c0_i32_0 = arith.constant 0 : i32
    return %arg0, %c0_i32 : i32, i32
  }
}

</mosaic_0001>

<bundles_post_ra>
// kernel: tpu_custom_call.1
= control target key start
LH: loop header
LB: loop body
LE: loop exit
PB: predicated region body
PF: predicated region fallthrough
CT: control target
= control target key end

     0   :  { %s917_s0 = inlined_call_operand.hbm [shape: f32[16,128], index: 0, kind: input, shape index: {}]   ;;  %s918_s1 = inlined_call_operand.hbm [shape: f32[16,128], index: 1, kind: input, shape index: {}]   ;;  %s919_s2 = inlined_call_operand.hbm [shape: f32[16,128], index: 2, kind: input, shape index: {}]   ;;  %s920_s3 = inlined_call_operand.vmem [shape: f32[1,128], index: 3, kind: input, shape index: {}]   ;;  %s921_s4 = inlined_call_operand.hbm [shape: f32[16,128], index: 4, kind: output, shape index: {}]  }
   0x1   :  { %923 = sst [smem:[#allocation14_spill]] %s918_s1 }
   0x2   :  { %9 = vsyncpa [#allocation3], 0 }
   0x3   :  { %11 = vsyncpa [#allocation3 + $0x1], 0 }
   0x4   :  { %12 = vsyncpa [#allocation6], 0 }
   0x5   :  { %14 = vsyncpa [#allocation6 + $0x1], 0 }
   0x6   :  { %15 = vsyncpa [#allocation4], 0 }
   0x7   :  { %17 = vsyncpa [#allocation4 + $0x1], 0  ;;  %s728_s15 = smov 0   ;;  %s730_s16 = smov 0  }
   0x8   :  { %s732_s17 = smov 0   ;;  %s734_s18 = smov 0  }
   0x9 LB: > { %924 = sst [smem:[#allocation12_spill]] %s697_s17  ;;  %s749_s19 = sadd.s32 4294967295, %s701_s18   ;;  %s701_s18 = sphi %s734_s18, %s936_s18   ;;  %s697_s17 = sphi %s732_s17, %s933_s17   ;;  %s693_s16 = sphi %s730_s16, %s935_s16   ;;  %s689_s15 = sphi %s728_s15, %s934_s15  }
   0xa   : > { %s458_s20 = sadd.s32 4294967294, %s701_s18   ;;  %s753_s21 = sadd.s32 1, %s701_s18  }
   0xb   : > { %s30_s22 = sadd.s32 1, %s697_s17  ;;  %s27_s23 = ssub.s32 %s701_s18, %s753_s21 }
   0xc   : > { %p37_p0 = scmp.ne.s32.totalorder %s697_s17, %s693_s16  ;;  %p28_p1 = scmp.eq.s32.totalorder %s27_s23, 0 }
   0xd   : > { %p38_p2 = scmp.eq.s32.totalorder %s701_s18, 0  ;;  %p43_p3 = scmp.ne.s32.totalorder %s693_s16, %s689_s15 }
   0xe   : > { %p44_p4 = scmp.eq.s32.totalorder %s749_s19, 0  ;;  %p140_p7 = scmp.eq.s32.totalorder %s749_s19, 1 }
   0xf   : > { %s765_s24 = scalar_select %p28_p1, %s697_s17, %s30_s22  }
  0x10   : > { %p39_p5 = por %p38_p2, %p37_p0  ;;  %p767_p6 = por %p44_p4, %p43_p3 }
  0x11   : > { %925 = sst [smem:[#allocation13_spill]] %s765_s24  ;;  %p146_p8 = scmp.eq.s32.totalorder %s458_s20, 1 }
  0x12   : > { %p460_p9 = scmp.ge.s32.totalorder %s701_s18, 2  ;;  %p498_p10 = scmp.lt.s32.totalorder %s701_s18, 2 }
  0x13   : > { %p774_p11 = por %p140_p7, %p37_p0  ;;  %p778_p12 = por %p146_p8, %p43_p3 }
  0x14   : > { %s169_s28 = sand.u32 1, %s697_s17   ;;  %s784_s29 = sshll.u32 %s701_s18, 3 }
  0x15   : > { %s788_s30 = sshll.u32 %s169_s28, 3  ;;  %p790_p13 = pnand %p498_p10, %p39_p5 }
  0x16   : > { %s188_s6 = sand.u32 1, %s701_s18   ;;  %s930_s1 = sld [smem:[#allocation14_spill]] }
  0x17   : > { %s192_s10 = scalar_lea.vmem [#allocation5], %s788_s30  ;;  %p467_p0 = scmp.ge.s32.totalorder %s701_s18, 1 }
  0x18   : > { %s200_s11 = sshll.u32 %s192_s10, 4  ;;  %s801_s13 = scalar_lea.sflag [#allocation6], %s188_s6  ;;  %s201_s11 = int_to_ptr.vmem [resolvable:$true] %s200_s11 }
  0x19   : > { %p545_p2 = pneg %p790_p13 }
  0x1c   : > { %s196_s9 = scalar_lea.hbm %s930_s1, %s784_s29  ;;  %s548_s7 = scalar_lea.hbm %s930_s1, 16 }
  0x1d   : > { %s198_s12 = sshll.u32 %s196_s9, 4  ;;  %s199_s12 = int_to_ptr.hbm [resolvable:$true] %s198_s12 }
  0x1e   : > { %s541_s14 = sshra.s32 %s199_s12, 4  ;;  %s542_s14 = int_to_ptr.hbm [resolvable:$true] %s541_s14 }
  0x1f   : > { %s543_s20 = scalar_lea.hbm %s542_s14, 8  ;;  %p549_p5 = scmp.lt.s32.totalorder %s542_s14, %s930_s1 }
  0x20   : > { %p544_p1 = scmp.ne.s32.totalorder %s542_s14, %s543_s20  ;;  %p550_p7 = scmp.lt.s32.totalorder %s548_s7, %s543_s20 }
  0x22   : > { %p546_p3 = pnand %p545_p2, %p544_p1  ;;  %p551_p8 = por %p550_p7, %p549_p5 }
  0x24   : > { %p547_p4 = pneg %p546_p3 }
  0x26   : > { %p552_p10 = pnand %p551_p8, %p547_p4 }
  0x28   : > { %555 = shalt.err (!%p552_p10)
}
  0x29   : > { %490 = dma.hbm_to_vmem [thread:$0]  (!%p790_p13), %s199_s12, 128, %s201_s11, %s801_s13  }
  0x2a   : > { %p224_p1 = scmp.lt.s32.totalorder %s701_s18, 3  ;;  %s177_s22 = scalar_lea.hbm %s917_s0, %s784_s29 }
  0x2b   : > { %s179_s20 = sshll.u32 %s177_s22, 4  ;;  %s173_s23 = scalar_lea.vmem [#allocation2], %s788_s30  ;;  %s180_s20 = int_to_ptr.hbm [resolvable:$true] %s179_s20 }
  0x2c   : > { %p824_p3 = pnand %p467_p0, %p224_p1  ;;  %s181_s7 = sshll.u32 %s173_s23, 4  ;;  %s182_s7 = int_to_ptr.vmem [resolvable:$true] %s181_s7 }
  0x2d   : > { %s170_s8 = scalar_lea.sflag [#allocation3], %s169_s28  ;;  %s571_s9 = sshra.s32 %s180_s20, 4  ;;  %s572_s9 = int_to_ptr.hbm [resolvable:$true] %s571_s9 }
  0x2e   : > { %s573_s11 = scalar_lea.hbm %s572_s9, 8  ;;  %s578_s10 = scalar_lea.hbm %s917_s0, 16 }
  0x2f   : > { %p574_p4 = scmp.ne.s32.totalorder %s572_s9, %s573_s11  ;;  %p579_p0 = scmp.lt.s32.totalorder %s572_s9, %s917_s0 }
  0x30   : > { %p580_p8 = scmp.lt.s32.totalorder %s578_s10, %s573_s11 }
  0x31   : > { %p576_p5 = pnand %p574_p4, %p545_p2 }
  0x32   : > { %p581_p10 = por %p580_p8, %p579_p0 }
  0x33   : > { %p577_p7 = pneg %p576_p5 }
  0x35   : > { %p582_p1 = pnand %p581_p10, %p577_p7 }
  0x37   : > { %585 = shalt.err (!%p582_p1)
}
  0x38   : > { %487 = dma.hbm_to_vmem [thread:$0]  (!%p790_p13), %s180_s20, 128, %s182_s7, %s170_s8  }
  0x39   : > { %s215_s24 = scalar_lea.hbm %s919_s2, %s784_s29  ;;  %s211_s12 = scalar_lea.vmem [#allocation7], %s788_s30 }
  0x3a   : > { %s219_s6 = sshll.u32 %s211_s12, 4  ;;  %s217_s17 = sshll.u32 %s215_s24, 4  ;;  %s220_s6 = int_to_ptr.vmem [resolvable:$true] %s219_s6  ;;  %s218_s17 = int_to_ptr.hbm [resolvable:$true] %s217_s17 }
  0x3b   : > { %s601_s1 = sshra.s32 %s218_s17, 4  ;;  %s608_s20 = scalar_lea.hbm %s919_s2, 16  ;;  %s602_s1 = int_to_ptr.hbm [resolvable:$true] %s601_s1 }
  0x3c   : > { %s603_s9 = scalar_lea.hbm %s602_s1, 8  ;;  %p609_p0 = scmp.lt.s32.totalorder %s602_s1, %s919_s2 }
  0x3d   : > { %p604_p4 = scmp.ne.s32.totalorder %s602_s1, %s603_s9  ;;  %p610_p8 = scmp.lt.s32.totalorder %s608_s20, %s603_s9 }
  0x3f   : > { %p606_p5 = pnand %p604_p4, %p545_p2  ;;  %p611_p10 = por %p610_p8, %p609_p0 }
  0x41   : > { %p607_p7 = pneg %p606_p5 }
  0x43   : > { %p612_p1 = pnand %p611_p10, %p607_p7 }
  0x45   : > { %615 = shalt.err (!%p612_p1)
}
  0x46   : > { %493 = dma.hbm_to_vmem [thread:$0]  (!%p790_p13), %s218_s17, 128, %s220_s6, %s801_s13  }
  0x47   : > { %228 = sbr.rel (%p824_p3) target bundleno = 246 (0xf6), region = 36  ;;  %s862_s24 = sand.u32 (!%p824_p3), 1, %s693_s16  }
  0x48   : > { %s865_s29 = sshll.u32 (!%p824_p3), %s862_s24, 3  ;;  %s231_s30 = scalar_lea.sflag (!%p824_p3), [#allocation3], %s862_s24 }
  0x49   : > { %s234_s22 = scalar_lea.vmem (!%p824_p3), [#allocation2], %s865_s29 }
  0x4c   : > { %676 = dma.done.wait (%p767_p6), %s231_s30, 128  }
  0x4d   : > { %678 = vsyncadd (%p767_p6), %s231_s30, 4294967168  ;;  %s240_s17 = sand.u32 1, %s749_s19   ;;  %s244_s13 = scalar_lea.vmem [#allocation5], %s865_s29 }
  0x4e   : > { %s241_s5 = scalar_lea.sflag [#allocation6], %s240_s17 }
  0x4f   : > { %680 = dma.done.wait (%p767_p6), %s241_s5, 256  }
  0x50   : > { %682 = vsyncadd (%p767_p6), %s241_s5, 4294967040  ;;  %v291_v0 = vld [vmem:[%s234_s22] sm:$0xff]  ;;  %s254_s23 = scalar_lea.vmem [#allocation7], %s865_s29  ;;  %v298_v5 = vld [vmem:[%s244_s13] sm:$0xff]  ;;  %s473_s25 = sshll.u32 %s749_s19, 3 }
  0x51   : > { %v532_v1 = vld [vmem:[%s920_s3] ss:$0 sm:$0xff]  ;;  %s340_s1 = scalar_lea.hbm %s921_s4, %s473_s25  ;;  %s289_s9 = scalar_lea.vmem [#allocation8], %s865_s29 }
  0x52   : > { %v302_v2 = vld [vmem:[%s254_s23] sm:$0xff]  ;;  %v295_v3 = vmul.f32 %v532_v1, %v291_v0  ;;  %v299_v6 = vmul.f32 %v532_v1, %v298_v5  ;;  %s342_s11 = sshll.u32 %s289_s9, 4  ;;  %s344_s10 = sshll.u32 %s340_s1, 4  ;;  %s343_s11 = int_to_ptr.vmem [resolvable:$true] %s342_s11  ;;  %s345_s10 = int_to_ptr.hbm [resolvable:$true] %s344_s10 }
  0x53   : > { %v303_v4 = vmul.f32 %v532_v1, %v302_v2  ;;  %s330_s19 = scalar_lea.sflag [#allocation4], %s862_s24  ;;  %s645_s20 = sshra.s32 %s345_s10, 4  ;;  %s646_s20 = int_to_ptr.hbm [resolvable:$true] %s645_s20 }
  0x54   : > { %296 = vadd.xlane.f32.xlu0 %v295_v3  ;;  %s647_s7 = scalar_lea.hbm %s646_s20, 8  ;;  %s651_s29 = scalar_lea.hbm %s921_s4, 16 }
  0x55   : > { %304 = vadd.xlane.f32.xlu1 %v303_v4  ;;  %p648_p6 = scmp.ne.s32.totalorder %s646_s20, %s647_s7  ;;  %p652_p3 = scmp.lt.s32.totalorder %s646_s20, %s921_s4 }
  0x56   : > { %p653_p4 = scmp.lt.s32.totalorder %s651_s29, %s647_s7 }
  0x57   : > { %p649_p13 = pnand %p648_p6, %p774_p11 }
  0x58   : > { %p654_p5 = por %p653_p4, %p652_p3 }
  0x59   : > { %p650_p2 = pneg %p649_p13 }
  0x5b   : > { %p655_p7 = pnand %p654_p5, %p650_p2 }
  0x5c   : > { %300 = vadd.xlane.f32.xlu0 %v299_v6 }
  0xc7   : > { %v297_v7 = vpop.xlane.xlu0 %296 }
  0xc8   : > { %v305_v9 = vpop.xlane.xlu1 %304 }
  0xcf   : > { %v301_v8 = vpop.xlane.xlu0 %300 }
  0xd0   : > { %v306_v10 = vmax.f32 %v297_v7, %v301_v8 }
  0xd2   : > { %v307_v11 = vmax.f32 %v306_v10, %v305_v9 }
  0xd4   : > { %v308_v12 = vsub.f32 %v297_v7, %v307_v11  ;;  %v311_v13 = vsub.f32 %v301_v8, %v307_v11  ;;  %v314_v14 = vsub.f32 %v305_v9, %v307_v11 }
  0xd6   : > { %v309_v15 = vmul.f32 1.442695, %v308_v12  ;;  %v312_v16 = vmul.f32 1.442695, %v311_v13  ;;  %v315_v17 = vmul.f32 1.442695, %v314_v14 }
  0xd8   : > { %533 = vpow2.f32 %v309_v15 }
  0xd9   : > { %535 = vpow2.f32 %v312_v16 }
  0xda   : > { %537 = vpow2.f32 %v315_v17 }
  0xde   : > { %v534_v18 = vpop.eup %533 }
  0xdf   : > { %v536_v19 = vpop.eup %535 }
  0xe0   : > { %v317_v20 = vadd.f32 %v536_v19, %v534_v18  ;;  %v538_v21 = vpop.eup %537 }
  0xe2   : > { %v318_v22 = vadd.f32 %v538_v21, %v317_v20 }
  0xe4   : > { %539 = vrcp.f32 %v318_v22 }
  0xea   : > { %v540_v23 = vpop.eup %539 }
  0xeb   : > { %v320_v24 = vmul.f32 %v540_v23, %v534_v18  ;;  %v322_v25 = vmul.f32 %v540_v23, %v536_v19  ;;  %v325_v26 = vmul.f32 %v540_v23, %v538_v21 }
  0xed   : > { %v321_v27 = vmul.f32 %v320_v24, %v291_v0  ;;  %v323_v28 = vmul.f32 %v322_v25, %v298_v5  ;;  %v326_v29 = vmul.f32 %v325_v26, %v302_v2 }
  0xef   : > { %v324_v30 = vadd.f32 %v323_v28, %v321_v27 }
  0xf1   : > { %v327_v31 = vadd.f32 %v326_v29, %v324_v30 }
  0xf3   : > { %328 = vst [vmem:[%s289_s9] sm:$0xff] %v327_v31 }
  0xf4   : > { %658 = shalt.err (!%p655_p7)
}
  0xf5   : > { %482 = dma.vmem_to_hbm [thread:$0]  (%p774_p11), %s343_s11, 128, %s345_s10, %s330_s19  }
  0xf6 PF: > { %s356_s24 = sand.u32 1, %s689_s15   ;;  %p495_p0 = pnand %p460_p9, %p778_p12 }
  0xf7   : > { %s357_s5 = scalar_lea.sflag [#allocation4], %s356_s24 }
  0xf8   : > { %p496_p8 = pneg %p495_p0 }
  0xfa   : > { %684 = dma.done.wait (%p496_p8), %s357_s5, 128  }
  0xfb   : > { %686 = vsyncadd (%p496_p8), %s357_s5, 4294967168  ;;  %s932_s13 = sld [smem:[#allocation12_spill]]  ;;  %p20_p10 = scmp.ge.s32.totalorder %s753_s21, 4  }
  0xfc   : > { %s933_s17 = sld [smem:[#allocation13_spill]]  ;;  %s934_s15 = smov %s693_s16 }
  0xfd   : > { %s936_s18 = smov %s753_s21  ;;  %22 = sbr.rel (!%p20_p10) target bundleno = 9 (0x9), region = 105 }
 0x101   : > { %s935_s16 = smov %s932_s13 }
 0x102   :  { %363 = vsyncpa [#allocation3], 1 }
 0x103   :  { %365 = vsyncpa [#allocation3 + $0x1], 1 }
 0x104   :  { %366 = vsyncpa [#allocation6], 1 }
 0x105   :  { %368 = vsyncpa [#allocation6 + $0x1], 1 }
 0x106   :  { %369 = vsyncpa [#allocation4], 1 }
 0x107   :  { %371 = vsyncpa [#allocation4 + $0x1], 1 }

</bundles_post_ra>
